<compile_context>
chip_gen: v7x
topology: tpu7x:2x2x1
jax: 0.10.0
libtpu: 0.0.40
codegen_flags: <defaults>
</compile_context>

<pallas_src>
import functools
import math

import jax
import jax.numpy as jnp
from jax.experimental import pallas as pl
from jax.experimental.pallas import tpu as pltpu

FREQS = (0.5, 1.0, 2.0, 4.0, 8.0)
NEG_SLOPE = 0.2  # LeakyReLU(0.2)


def _leaky_relu(h, negative_slope):
    return jnp.where(h >= 0, h, negative_slope * h)


def _round_up(n, m):
    return ((n + m - 1) // m) * m


def _posenc_mlp_kernel(xT_ref, w1s_ref, w1c_ref, b1_ref, w2_ref, b2_ref,
                       w3_ref, b3_ref, oT_ref, *, freqs, negative_slope,
                       use_double_angle):
    """Batch-on-lane layout: every activation is (features, TB)."""
    xT = xT_ref[...]                                   # (nin, TB) f32
    nfreq = len(freqs)

    def dot32(w, a):
        # NOTE: DEFAULT matmul precision passes the 1e-4 check at nh=32; for
        # much larger nh, add precision=jax.lax.Precision.HIGHEST (cheap,
        # K <= nh) if bit-level agreement with an f32 reference is required.
        return jnp.dot(w, a, preferred_element_type=jnp.float32)

    # Layer 1, accumulated per frequency:
    #   h = b1 + sum_f ( W1s[f] @ sin(freq_f * x^T) + W1c[f] @ cos(freq_f * x^T) )
    # The MXU is nearly idle in this kernel, so 2*F skinny K=nin matmuls are
    # free and avoid both the (nin*F, TB) slab and its sublane concatenate.
    acc = None
    if use_double_angle:
        # freqs[k] = freqs[0] * 2**k: evaluate sin/cos once, then double.
        s = jnp.sin(freqs[0] * xT)
        c = jnp.cos(freqs[0] * xT)
        for f in range(nfreq):
            if f > 0:
                # sin(2t) = 2 sin t cos t ; cos(2t) = 1 - 2 sin^2 t
                # (RHS tuple is fully evaluated with the old s, c).
                s, c = 2.0 * (s * c), 1.0 - 2.0 * (s * s)
            term = dot32(w1s_ref[f], s) + dot32(w1c_ref[f], c)
            acc = term if acc is None else acc + term
    else:
        for f in range(nfreq):
            z = freqs[f] * xT
            term = dot32(w1s_ref[f], jnp.sin(z)) + dot32(w1c_ref[f], jnp.cos(z))
            acc = term if acc is None else acc + term

    h = acc + b1_ref[...]                              # (nh, TB)
    h = _leaky_relu(h, negative_slope)

    h = dot32(w2_ref[...], h) + b2_ref[...]            # (nh, TB)
    h = _leaky_relu(h, negative_slope)

    y = dot32(w3_ref[...], h) + b3_ref[...]            # (nout, TB)
    oT_ref[...] = y.astype(oT_ref.dtype)


def posenc_mlp_t(xT, params, freqs=FREQS, negative_slope=NEG_SLOPE, *,
                 block_b=16384, min_grid_steps=8):
    """PosEncMLP forward, native transposed layout: (nin, B) -> (nout, B).

    params (PyTorch-native (out, in) layout):
      w1 (nh, nin*len(freqs)*2), b1 (nh,),
      w2 (nh, nh),               b2 (nh,),
      w3 (nout, nh),             b3 (nout,).
    """
    w1, b1, w2, b2, w3, b3 = (params[k] for k in ("w1", "b1", "w2", "b2", "w3", "b3"))
    nin, B = xT.shape
    nfreq = len(freqs)
    nfeat = nin * nfreq                        # width of the sine (or cosine) half
    nh = w1.shape[0]
    nout = w3.shape[0]
    assert w1.shape == (nh, 2 * nfeat)

    # --- batch tile selection -------------------------------------------------
    # Batch sits on the 128-wide lane axis; feature dims stay full/untiled.
    tb = _round_up(max(1, min(int(block_b), B)), 128)
    tb = min(tb, 32 * 1024)                    # working set stays < ~20 MiB everywhere
    if B >= min_grid_steps * 128:
        # Keep >= min_grid_steps grid steps when the batch allows it (v7x
        # megacore sharding + deeper DMA pipeline), without over-splitting
        # small batches below a 1024-wide tile.
        tb = min(tb, max(1024, _round_up(pl.cdiv(B, min_grid_steps), 128)))
    tb = max(tb, 128)
    grid = (pl.cdiv(B, tb),)                   # ragged last tile: OOB reads are
                                               # harmless, OOB writes are masked.

    # --- operands ---------------------------------------------------------------
    xT = xT.astype(jnp.float32)
    # Split layer-1 weight per (frequency, sin/cos): column f*nin + d of the
    # sine (resp. cosine) half multiplies sin(freqs[f] * x[:, d]).
    w1s = w1[:, :nfeat].reshape(nh, nfreq, nin).transpose(1, 0, 2)   # (F, nh, nin)
    w1c = w1[:, nfeat:].reshape(nh, nfreq, nin).transpose(1, 0, 2)   # (F, nh, nin)
    b1c = b1.reshape(nh, 1)
    b2c = b2.reshape(nh, 1)
    b3c = b3.reshape(nout, 1)

    freqs_f = tuple(float(f) for f in freqs)
    use_double_angle = all(freqs_f[i + 1] == 2.0 * freqs_f[i]
                           for i in range(nfreq - 1))

    kernel = functools.partial(
        _posenc_mlp_kernel,
        freqs=freqs_f,
        negative_slope=float(negative_slope),
        use_double_angle=use_double_angle,
    )

    def _resident(a):
        # Full-array block with a constant index_map -> stays resident in VMEM
        # across all grid steps.
        return pl.BlockSpec(a.shape, lambda i, _nd=a.ndim: (0,) * _nd)

    n_weight = int(w1.size + b1.size + w2.size + b2.size + w3.size + b3.size)
    cost = pl.CostEstimate(
        flops=int(B) * (2 * nh * 2 * nfeat + 2 * nh * nh + 2 * nout * nh),
        transcendentals=int(B) * nin * (2 if use_double_angle else 2 * nfreq),
        bytes_accessed=4 * int(B) * (nin + nout) + 4 * n_weight,
    )

    outT = pl.pallas_call(
        kernel,
        out_shape=jax.ShapeDtypeStruct((nout, B), jnp.float32),
        grid=grid,
        in_specs=[
            pl.BlockSpec((nin, tb), lambda i: (0, i)),          # x^T batch tile
            _resident(w1s), _resident(w1c), _resident(b1c),
            _resident(w2), _resident(b2c),
            _resident(w3), _resident(b3c),
        ],
        out_specs=pl.BlockSpec((nout, tb), lambda i: (0, i)),    # out^T batch tile
        compiler_params=pltpu.CompilerParams(
            dimension_semantics=("parallel",),
            vmem_limit_bytes=32 * 1024 * 1024,
        ),
        cost_estimate=cost,
    )(xT, w1s, w1c, b1c, w2, b2c, w3, b3c)
    return outT


def posenc_mlp(x, params, freqs=FREQS, negative_slope=NEG_SLOPE, *,
               block_b=16384):
    """Convenience wrapper for row-major callers: x (B, nin) -> (B, nout).

    The transposes here are extra HBM traffic; performance-critical callers
    (especially on v5e, where this op is HBM-bound) should keep activations in
    (features, batch) layout end-to-end and call posenc_mlp_t directly.
    """
    xT = x.astype(jnp.float32).T
    outT = posenc_mlp_t(xT, params, freqs, negative_slope, block_b=block_b)
    return outT.T


def _init_linear(key, fan_in, fan_out):
    """PyTorch nn.Linear default init, PyTorch-native (out, in) weight layout."""
    kw, kb = jax.random.split(key)
    bound = 1.0 / math.sqrt(fan_in)
    w = jax.random.uniform(kw, (fan_out, fan_in), jnp.float32, -bound, bound)
    b = jax.random.uniform(kb, (fan_out,), jnp.float32, -bound, bound)
    return w, b


def _reference(x, params, freqs=FREQS, negative_slope=NEG_SLOPE):
    sines = [jnp.sin(x * f) for f in freqs]
    coses = [jnp.cos(x * f) for f in freqs]
    enc = jnp.concatenate(sines + coses, axis=1)
    h = enc @ params["w1"].T + params["b1"]
    h = jnp.where(h >= 0, h, negative_slope * h)
    h = h @ params["w2"].T + params["b2"]
    h = jnp.where(h >= 0, h, negative_slope * h)
    return h @ params["w3"].T + params["b3"]


if __name__ == "__main__":
    # Small shapes; B is deliberately NOT a multiple of 128 so the ragged
    # (masked) last tile and the multi-step grid path are both exercised.
    B, nin, nout, nh = 300, 2, 2, 32
    nenc = nin * len(FREQS) * 2          # 20

    key = jax.random.PRNGKey(0)
    kx, k1, k2, k3 = jax.random.split(key, 4)

    x = jax.random.normal(kx, (B, nin), jnp.float32)
    w1, b1 = _init_linear(k1, nenc, nh)
    w2, b2 = _init_linear(k2, nh, nh)
    w3, b3 = _init_linear(k3, nh, nout)
    params = dict(w1=w1, b1=b1, w2=w2, b2=b2, w3=w3, b3=b3)

    ref = _reference(x, params)

    # Small tile -> 3 grid steps, ragged last block (300 = 2*128 + 44).
    out_small = jax.block_until_ready(posenc_mlp(x, params, block_b=128))
    # Default (large-tile) path -> single ragged step covering the whole batch.
    out_big = jax.block_until_ready(posenc_mlp(x, params))

    for out in (out_small, out_big):
        assert out.shape == (B, nout)
        assert jnp.allclose(out, ref, atol=1e-4, rtol=1e-4), \
            float(jnp.max(jnp.abs(out - ref)))

    print("KERNEL_OK")
</pallas_src>

<mosaic_0001>
module attributes {stable_mosaic.version = 11 : i64} {
  func.func @_posenc_mlp_kernel(%arg0: i32, %arg1: memref<2x128xf32, #tpu.memory_space<vmem>>, %arg2: memref<5x32x2xf32, #tpu.memory_space<vmem>>, %arg3: memref<5x32x2xf32, #tpu.memory_space<vmem>>, %arg4: memref<32x1xf32, #tpu.memory_space<vmem>>, %arg5: memref<32x32xf32, #tpu.memory_space<vmem>>, %arg6: memref<32x1xf32, #tpu.memory_space<vmem>>, %arg7: memref<2x32xf32, #tpu.memory_space<vmem>>, %arg8: memref<2x1xf32, #tpu.memory_space<vmem>>, %arg9: memref<2x128xf32, #tpu.memory_space<vmem>>) attributes {dimension_semantics = [#tpu.dimension_semantics<parallel>], iteration_bounds = array<i64: 3>, scalar_prefetch = 0 : i64, scratch_operands = 0 : i64, tpu.core_type = #tpu.core_type<tc>, window_params = [{transform_indices = @transform_0, window_bounds = array<i64: 2, 128>}, {pipeline_mode = #tpu.pipeline_mode<synchronous>, transform_indices = @transform_1, window_bounds = array<i64: 5, 32, 2>}, {pipeline_mode = #tpu.pipeline_mode<synchronous>, transform_indices = @transform_2, window_bounds = array<i64: 5, 32, 2>}, {pipeline_mode = #tpu.pipeline_mode<synchronous>, transform_indices = @transform_3, window_bounds = array<i64: 32, 1>}, {pipeline_mode = #tpu.pipeline_mode<synchronous>, transform_indices = @transform_4, window_bounds = array<i64: 32, 32>}, {pipeline_mode = #tpu.pipeline_mode<synchronous>, transform_indices = @transform_5, window_bounds = array<i64: 32, 1>}, {pipeline_mode = #tpu.pipeline_mode<synchronous>, transform_indices = @transform_6, window_bounds = array<i64: 2, 32>}, {pipeline_mode = #tpu.pipeline_mode<synchronous>, transform_indices = @transform_7, window_bounds = array<i64: 2, 1>}, {transform_indices = @transform_8, window_bounds = array<i64: 2, 128>}]} {
    %c0 = arith.constant 0 : index
    %c0_0 = arith.constant 0 : index
    %0 = vector.load %arg1[%c0, %c0_0] : memref<2x128xf32, #tpu.memory_space<vmem>>, vector<2x128xf32>
    %cst = arith.constant 5.000000e-01 : f32
    %1 = vector.broadcast %cst : f32 to vector<2x128xf32>
    %2 = arith.mulf %1, %0 : vector<2x128xf32>
    %3 = math.sin %2 : vector<2x128xf32>
    %cst_1 = arith.constant 5.000000e-01 : f32
    %4 = vector.broadcast %cst_1 : f32 to vector<2x128xf32>
    %5 = arith.mulf %4, %0 : vector<2x128xf32>
    %6 = math.cos %5 : vector<2x128xf32>
    %c0_2 = arith.constant 0 : index
    %c0_3 = arith.constant 0 : index
    %c0_4 = arith.constant 0 : index
    %7 = vector.load %arg2[%c0_2, %c0_3, %c0_4] : memref<5x32x2xf32, #tpu.memory_space<vmem>>, vector<1x32x2xf32>
    %8 = vector.shape_cast %7 : vector<1x32x2xf32> to vector<32x2xf32>
    %cst_5 = arith.constant dense<0.000000e+00> : vector<32x128xf32>
    %9 = tpu.matmul %8, %3, %cst_5 {dimension_numbers = #tpu.dot_dimension_numbers<[1], [0], [0], [1], [0, 0, 1, 1], [], []>} : vector<32x2xf32>, vector<2x128xf32>, vector<32x128xf32> -> vector<32x128xf32>
    %c0_6 = arith.constant 0 : index
    %c0_7 = arith.constant 0 : index
    %c0_8 = arith.constant 0 : index
    %10 = vector.load %arg3[%c0_6, %c0_7, %c0_8] : memref<5x32x2xf32, #tpu.memory_space<vmem>>, vector<1x32x2xf32>
    %11 = vector.shape_cast %10 : vector<1x32x2xf32> to vector<32x2xf32>
    %cst_9 = arith.constant dense<0.000000e+00> : vector<32x128xf32>
    %12 = tpu.matmul %11, %6, %cst_9 {dimension_numbers = #tpu.dot_dimension_numbers<[1], [0], [0], [1], [0, 0, 1, 1], [], []>} : vector<32x2xf32>, vector<2x128xf32>, vector<32x128xf32> -> vector<32x128xf32>
    %13 = arith.addf %9, %12 : vector<32x128xf32>
    %14 = arith.mulf %3, %6 : vector<2x128xf32>
    %cst_10 = arith.constant 2.000000e+00 : f32
    %15 = vector.broadcast %cst_10 : f32 to vector<2x128xf32>
    %16 = arith.mulf %15, %14 : vector<2x128xf32>
    %17 = arith.mulf %3, %3 : vector<2x128xf32>
    %cst_11 = arith.constant 2.000000e+00 : f32
    %18 = vector.broadcast %cst_11 : f32 to vector<2x128xf32>
    %19 = arith.mulf %18, %17 : vector<2x128xf32>
    %cst_12 = arith.constant 1.000000e+00 : f32
    %20 = vector.broadcast %cst_12 : f32 to vector<2x128xf32>
    %21 = arith.subf %20, %19 : vector<2x128xf32>
    %c1 = arith.constant 1 : index
    %c0_13 = arith.constant 0 : index
    %c0_14 = arith.constant 0 : index
    %22 = vector.load %arg2[%c1, %c0_13, %c0_14] : memref<5x32x2xf32, #tpu.memory_space<vmem>>, vector<1x32x2xf32>
    %23 = vector.shape_cast %22 : vector<1x32x2xf32> to vector<32x2xf32>
    %cst_15 = arith.constant dense<0.000000e+00> : vector<32x128xf32>
    %24 = tpu.matmul %23, %16, %cst_15 {dimension_numbers = #tpu.dot_dimension_numbers<[1], [0], [0], [1], [0, 0, 1, 1], [], []>} : vector<32x2xf32>, vector<2x128xf32>, vector<32x128xf32> -> vector<32x128xf32>
    %c1_16 = arith.constant 1 : index
    %c0_17 = arith.constant 0 : index
    %c0_18 = arith.constant 0 : index
    %25 = vector.load %arg3[%c1_16, %c0_17, %c0_18] : memref<5x32x2xf32, #tpu.memory_space<vmem>>, vector<1x32x2xf32>
    %26 = vector.shape_cast %25 : vector<1x32x2xf32> to vector<32x2xf32>
    %cst_19 = arith.constant dense<0.000000e+00> : vector<32x128xf32>
    %27 = tpu.matmul %26, %21, %cst_19 {dimension_numbers = #tpu.dot_dimension_numbers<[1], [0], [0], [1], [0, 0, 1, 1], [], []>} : vector<32x2xf32>, vector<2x128xf32>, vector<32x128xf32> -> vector<32x128xf32>
    %28 = arith.addf %24, %27 : vector<32x128xf32>
    %29 = arith.addf %13, %28 : vector<32x128xf32>
    %30 = arith.mulf %16, %21 : vector<2x128xf32>
    %cst_20 = arith.constant 2.000000e+00 : f32
    %31 = vector.broadcast %cst_20 : f32 to vector<2x128xf32>
    %32 = arith.mulf %31, %30 : vector<2x128xf32>
    %33 = arith.mulf %16, %16 : vector<2x128xf32>
    %cst_21 = arith.constant 2.000000e+00 : f32
    %34 = vector.broadcast %cst_21 : f32 to vector<2x128xf32>
    %35 = arith.mulf %34, %33 : vector<2x128xf32>
    %cst_22 = arith.constant 1.000000e+00 : f32
    %36 = vector.broadcast %cst_22 : f32 to vector<2x128xf32>
    %37 = arith.subf %36, %35 : vector<2x128xf32>
    %c2 = arith.constant 2 : index
    %c0_23 = arith.constant 0 : index
    %c0_24 = arith.constant 0 : index
    %38 = vector.load %arg2[%c2, %c0_23, %c0_24] : memref<5x32x2xf32, #tpu.memory_space<vmem>>, vector<1x32x2xf32>
    %39 = vector.shape_cast %38 : vector<1x32x2xf32> to vector<32x2xf32>
    %cst_25 = arith.constant dense<0.000000e+00> : vector<32x128xf32>
    %40 = tpu.matmul %39, %32, %cst_25 {dimension_numbers = #tpu.dot_dimension_numbers<[1], [0], [0], [1], [0, 0, 1, 1], [], []>} : vector<32x2xf32>, vector<2x128xf32>, vector<32x128xf32> -> vector<32x128xf32>
    %c2_26 = arith.constant 2 : index
    %c0_27 = arith.constant 0 : index
    %c0_28 = arith.constant 0 : index
    %41 = vector.load %arg3[%c2_26, %c0_27, %c0_28] : memref<5x32x2xf32, #tpu.memory_space<vmem>>, vector<1x32x2xf32>
    %42 = vector.shape_cast %41 : vector<1x32x2xf32> to vector<32x2xf32>
    %cst_29 = arith.constant dense<0.000000e+00> : vector<32x128xf32>
    %43 = tpu.matmul %42, %37, %cst_29 {dimension_numbers = #tpu.dot_dimension_numbers<[1], [0], [0], [1], [0, 0, 1, 1], [], []>} : vector<32x2xf32>, vector<2x128xf32>, vector<32x128xf32> -> vector<32x128xf32>
    %44 = arith.addf %40, %43 : vector<32x128xf32>
    %45 = arith.addf %29, %44 : vector<32x128xf32>
    %46 = arith.mulf %32, %37 : vector<2x128xf32>
    %cst_30 = arith.constant 2.000000e+00 : f32
    %47 = vector.broadcast %cst_30 : f32 to vector<2x128xf32>
    %48 = arith.mulf %47, %46 : vector<2x128xf32>
    %49 = arith.mulf %32, %32 : vector<2x128xf32>
    %cst_31 = arith.constant 2.000000e+00 : f32
    %50 = vector.broadcast %cst_31 : f32 to vector<2x128xf32>
    %51 = arith.mulf %50, %49 : vector<2x128xf32>
    %cst_32 = arith.constant 1.000000e+00 : f32
    %52 = vector.broadcast %cst_32 : f32 to vector<2x128xf32>
    %53 = arith.subf %52, %51 : vector<2x128xf32>
    %c3 = arith.constant 3 : index
    %c0_33 = arith.constant 0 : index
    %c0_34 = arith.constant 0 : index
    %54 = vector.load %arg2[%c3, %c0_33, %c0_34] : memref<5x32x2xf32, #tpu.memory_space<vmem>>, vector<1x32x2xf32>
    %55 = vector.shape_cast %54 : vector<1x32x2xf32> to vector<32x2xf32>
    %cst_35 = arith.constant dense<0.000000e+00> : vector<32x128xf32>
    %56 = tpu.matmul %55, %48, %cst_35 {dimension_numbers = #tpu.dot_dimension_numbers<[1], [0], [0], [1], [0, 0, 1, 1], [], []>} : vector<32x2xf32>, vector<2x128xf32>, vector<32x128xf32> -> vector<32x128xf32>
    %c3_36 = arith.constant 3 : index
    %c0_37 = arith.constant 0 : index
    %c0_38 = arith.constant 0 : index
    %57 = vector.load %arg3[%c3_36, %c0_37, %c0_38] : memref<5x32x2xf32, #tpu.memory_space<vmem>>, vector<1x32x2xf32>
    %58 = vector.shape_cast %57 : vector<1x32x2xf32> to vector<32x2xf32>
    %cst_39 = arith.constant dense<0.000000e+00> : vector<32x128xf32>
    %59 = tpu.matmul %58, %53, %cst_39 {dimension_numbers = #tpu.dot_dimension_numbers<[1], [0], [0], [1], [0, 0, 1, 1], [], []>} : vector<32x2xf32>, vector<2x128xf32>, vector<32x128xf32> -> vector<32x128xf32>
    %60 = arith.addf %56, %59 : vector<32x128xf32>
    %61 = arith.addf %45, %60 : vector<32x128xf32>
    %62 = arith.mulf %48, %53 : vector<2x128xf32>
    %cst_40 = arith.constant 2.000000e+00 : f32
    %63 = vector.broadcast %cst_40 : f32 to vector<2x128xf32>
    %64 = arith.mulf %63, %62 : vector<2x128xf32>
    %65 = arith.mulf %48, %48 : vector<2x128xf32>
    %cst_41 = arith.constant 2.000000e+00 : f32
    %66 = vector.broadcast %cst_41 : f32 to vector<2x128xf32>
    %67 = arith.mulf %66, %65 : vector<2x128xf32>
    %cst_42 = arith.constant 1.000000e+00 : f32
    %68 = vector.broadcast %cst_42 : f32 to vector<2x128xf32>
    %69 = arith.subf %68, %67 : vector<2x128xf32>
    %c4 = arith.constant 4 : index
    %c0_43 = arith.constant 0 : index
    %c0_44 = arith.constant 0 : index
    %70 = vector.load %arg2[%c4, %c0_43, %c0_44] : memref<5x32x2xf32, #tpu.memory_space<vmem>>, vector<1x32x2xf32>
    %71 = vector.shape_cast %70 : vector<1x32x2xf32> to vector<32x2xf32>
    %cst_45 = arith.constant dense<0.000000e+00> : vector<32x128xf32>
    %72 = tpu.matmul %71, %64, %cst_45 {dimension_numbers = #tpu.dot_dimension_numbers<[1], [0], [0], [1], [0, 0, 1, 1], [], []>} : vector<32x2xf32>, vector<2x128xf32>, vector<32x128xf32> -> vector<32x128xf32>
    %c4_46 = arith.constant 4 : index
    %c0_47 = arith.constant 0 : index
    %c0_48 = arith.constant 0 : index
    %73 = vector.load %arg3[%c4_46, %c0_47, %c0_48] : memref<5x32x2xf32, #tpu.memory_space<vmem>>, vector<1x32x2xf32>
    %74 = vector.shape_cast %73 : vector<1x32x2xf32> to vector<32x2xf32>
    %cst_49 = arith.constant dense<0.000000e+00> : vector<32x128xf32>
    %75 = tpu.matmul %74, %69, %cst_49 {dimension_numbers = #tpu.dot_dimension_numbers<[1], [0], [0], [1], [0, 0, 1, 1], [], []>} : vector<32x2xf32>, vector<2x128xf32>, vector<32x128xf32> -> vector<32x128xf32>
    %76 = arith.addf %72, %75 : vector<32x128xf32>
    %77 = arith.addf %61, %76 : vector<32x128xf32>
    %c0_50 = arith.constant 0 : index
    %c0_51 = arith.constant 0 : index
    %78 = vector.load %arg4[%c0_50, %c0_51] : memref<32x1xf32, #tpu.memory_space<vmem>>, vector<32x1xf32>
    %79 = vector.broadcast %78 : vector<32x1xf32> to vector<32x128xf32>
    %80 = arith.addf %77, %79 : vector<32x128xf32>
    %cst_52 = arith.constant 0.000000e+00 : f32
    %81 = vector.broadcast %cst_52 : f32 to vector<32x128xf32>
    %82 = arith.cmpf oge, %80, %81 : vector<32x128xf32>
    %cst_53 = arith.constant 2.000000e-01 : f32
    %83 = vector.broadcast %cst_53 : f32 to vector<32x128xf32>
    %84 = arith.mulf %83, %80 : vector<32x128xf32>
    %85 = arith.select %82, %80, %84 : vector<32x128xi1>, vector<32x128xf32>
    %c0_54 = arith.constant 0 : index
    %c0_55 = arith.constant 0 : index
    %86 = vector.load %arg5[%c0_54, %c0_55] : memref<32x32xf32, #tpu.memory_space<vmem>>, vector<32x32xf32>
    %cst_56 = arith.constant dense<0.000000e+00> : vector<32x128xf32>
    %87 = tpu.matmul %86, %85, %cst_56 {dimension_numbers = #tpu.dot_dimension_numbers<[1], [0], [0], [1], [0, 0, 1, 1], [], []>} : vector<32x32xf32>, vector<32x128xf32>, vector<32x128xf32> -> vector<32x128xf32>
    %c0_57 = arith.constant 0 : index
    %c0_58 = arith.constant 0 : index
    %88 = vector.load %arg6[%c0_57, %c0_58] : memref<32x1xf32, #tpu.memory_space<vmem>>, vector<32x1xf32>
    %89 = vector.broadcast %88 : vector<32x1xf32> to vector<32x128xf32>
    %90 = arith.addf %87, %89 : vector<32x128xf32>
    %cst_59 = arith.constant 0.000000e+00 : f32
    %91 = vector.broadcast %cst_59 : f32 to vector<32x128xf32>
    %92 = arith.cmpf oge, %90, %91 : vector<32x128xf32>
    %cst_60 = arith.constant 2.000000e-01 : f32
    %93 = vector.broadcast %cst_60 : f32 to vector<32x128xf32>
    %94 = arith.mulf %93, %90 : vector<32x128xf32>
    %95 = arith.select %92, %90, %94 : vector<32x128xi1>, vector<32x128xf32>
    %c0_61 = arith.constant 0 : index
    %c0_62 = arith.constant 0 : index
    %96 = vector.load %arg7[%c0_61, %c0_62] : memref<2x32xf32, #tpu.memory_space<vmem>>, vector<2x32xf32>
    %cst_63 = arith.constant dense<0.000000e+00> : vector<2x128xf32>
    %97 = tpu.matmul %96, %95, %cst_63 {dimension_numbers = #tpu.dot_dimension_numbers<[1], [0], [0], [1], [0, 0, 1, 1], [], []>} : vector<2x32xf32>, vector<32x128xf32>, vector<2x128xf32> -> vector<2x128xf32>
    %c0_64 = arith.constant 0 : index
    %c0_65 = arith.constant 0 : index
    %98 = vector.load %arg8[%c0_64, %c0_65] : memref<2x1xf32, #tpu.memory_space<vmem>>, vector<2x1xf32>
    %99 = vector.broadcast %98 : vector<2x1xf32> to vector<2x128xf32>
    %100 = arith.addf %97, %99 : vector<2x128xf32>
    %c0_66 = arith.constant 0 : index
    %c0_67 = arith.constant 0 : index
    %101 = vector.load %arg9[%c0_66, %c0_67] : memref<2x128xf32, #tpu.memory_space<vmem>>, vector<2x128xf32>
    tpu.vector_store %arg9[%c0_66, %c0_67], %100 {strides = array<i32>} : memref<2x128xf32, #tpu.memory_space<vmem>>, vector<2x128xf32>,
    return
  }
  func.func @transform_0(%arg0: i32) -> (i32, i32) {
    %c0_i32 = arith.constant 0 : i32
    %c0_i32_0 = arith.constant 0 : i32
    return %c0_i32, %arg0 : i32, i32
  }
  func.func @transform_1(%arg0: i32) -> (i32, i32, i32) {
    %c0_i32 = arith.constant 0 : i32
    %c0_i32_0 = arith.constant 0 : i32
    %c0_i32_1 = arith.constant 0 : i32
    %c0_i32_2 = arith.constant 0 : i32
    return %c0_i32, %c0_i32_0, %c0_i32_1 : i32, i32, i32
  }
  func.func @transform_2(%arg0: i32) -> (i32, i32, i32) {
    %c0_i32 = arith.constant 0 : i32
    %c0_i32_0 = arith.constant 0 : i32
    %c0_i32_1 = arith.constant 0 : i32
    %c0_i32_2 = arith.constant 0 : i32
    return %c0_i32, %c0_i32_0, %c0_i32_1 : i32, i32, i32
  }
  func.func @transform_3(%arg0: i32) -> (i32, i32) {
    %c0_i32 = arith.constant 0 : i32
    %c0_i32_0 = arith.constant 0 : i32
    %c0_i32_1 = arith.constant 0 : i32
    return %c0_i32, %c0_i32_0 : i32, i32
  }
  func.func @transform_4(%arg0: i32) -> (i32, i32) {
    %c0_i32 = arith.constant 0 : i32
    %c0_i32_0 = arith.constant 0 : i32
    %c0_i32_1 = arith.constant 0 : i32
    return %c0_i32, %c0_i32_0 : i32, i32
  }
  func.func @transform_5(%arg0: i32) -> (i32, i32) {
    %c0_i32 = arith.constant 0 : i32
    %c0_i32_0 = arith.constant 0 : i32
    %c0_i32_1 = arith.constant 0 : i32
    return %c0_i32, %c0_i32_0 : i32, i32
  }
  func.func @transform_6(%arg0: i32) -> (i32, i32) {
    %c0_i32 = arith.constant 0 : i32
    %c0_i32_0 = arith.constant 0 : i32
    %c0_i32_1 = arith.constant 0 : i32
    return %c0_i32, %c0_i32_0 : i32, i32
  }
  func.func @transform_7(%arg0: i32) -> (i32, i32) {
    %c0_i32 = arith.constant 0 : i32
    %c0_i32_0 = arith.constant 0 : i32
    %c0_i32_1 = arith.constant 0 : i32
    return %c0_i32, %c0_i32_0 : i32, i32
  }
  func.func @transform_8(%arg0: i32) -> (i32, i32) {
    %c0_i32 = arith.constant 0 : i32
    %c0_i32_0 = arith.constant 0 : i32
    return %c0_i32, %arg0 : i32, i32
  }
}

</mosaic_0001>

<bundles_post_ra>
// kernel: tpu_custom_call.1
= control target key start
LH: loop header
LB: loop body
LE: loop exit
PB: predicated region body
PF: predicated region fallthrough
CT: control target
= control target key end

     0   :  { %13 = vsyncpa [#allocation3], 0  ;;  %s2784_s0 = inlined_call_operand.vmem [shape: f32[2,300], index: 0, kind: input, shape index: {}]   ;;  %s2785_s1 = inlined_call_operand.vmem [shape: f32[5,32,2], index: 1, kind: input, shape index: {}]   ;;  %s2786_s2 = inlined_call_operand.vmem [shape: f32[5,32,2], index: 2, kind: input, shape index: {}]   ;;  %s2787_s3 = inlined_call_operand.vmem [shape: f32[32,1], index: 3, kind: input, shape index: {}]   ;;  %s2788_s4 = inlined_call_operand.vmem [shape: f32[32,32], index: 4, kind: input, shape index: {}]   ;;  %s2789_s5 = inlined_call_operand.vmem [shape: f32[32,1], index: 5, kind: input, shape index: {}]   ;;  %s2790_s6 = inlined_call_operand.vmem [shape: f32[2,32], index: 6, kind: input, shape index: {}]   ;;  %s2791_s7 = inlined_call_operand.vmem [shape: f32[2,1], index: 7, kind: input, shape index: {}]   ;;  %s2792_s8 = inlined_call_operand.hbm [shape: f32[2,300], index: 8, kind: output, shape index: {}]  }
   0x1   :  { %15 = vsyncpa [#allocation3 + $0x1], 0  ;;  %s2430_s27 = smov 0   ;;  %s2432_s28 = smov 0  }
   0x2   :  { %s2434_s29 = smov 0   ;;  %s2436_s30 = smov 0  }
   0x3 LB: > { %s2451_s9 = sadd.s32 4294967295, %s2372_s30   ;;  %s1928_s10 = sadd.s32 4294967294, %s2372_s30   ;;  %s2372_s30 = sphi %s2436_s30, %s2798_s30   ;;  %s2368_s29 = sphi %s2434_s29, %s2797_s29   ;;  %s2364_s28 = sphi %s2432_s28, %s2796_s28   ;;  %s2360_s27 = sphi %s2430_s27, %s2795_s27  }
   0x4   : > { %s2455_s11 = sadd.s32 1, %s2372_s30   ;;  %s201_s12 = sadd.s32 1, %s2368_s29 }
   0x5   : > { %s198_s13 = ssub.s32 %s2372_s30, %s2455_s11  ;;  %p211_p0 = scmp.ne.s32.totalorder %s2368_s29, %s2364_s28 }
   0x6   : > { %p199_p1 = scmp.eq.s32.totalorder %s198_s13, 0  ;;  %p212_p2 = scmp.eq.s32.totalorder %s2451_s9, 2 }
   0x7   : > { %p217_p3 = scmp.ne.s32.totalorder %s2364_s28, %s2360_s27  ;;  %p218_p4 = scmp.eq.s32.totalorder %s1928_s10, 2 }
   0x8   : > { %s2466_s14 = scalar_select %p199_p1, %s2368_s29, %s201_s12  }
   0x9   : > { %p2468_p5 = por %p212_p2, %p211_p0  ;;  %p2472_p6 = por %p218_p4, %p217_p3 }
   0xa   : > { %p1931_p7 = scmp.ge.s32.totalorder %s2372_s30, 1  ;;  %p264_p8 = scmp.lt.s32.totalorder %s2372_s30, 4 }
   0xc   : > { %p265_p9 = pnand %p1931_p7, %p264_p8 }
   0xd   : > { %p297_p10 = scmp.lt.s32.totalorder (!%p265_p9), %s2451_s9, 2  ;;  %v514_v0 = vld [vmem:[%s2786_s2] sm:$0xff] (!%p265_p9)  ;;  %vm518_vm0 = vcmask (!%p265_p9), 15360   ;;  %v1598_v13 = vld [vmem:[%s2787_s3 + $0x10] sm:$0xff] (!%p265_p9)  ;;  %v2374_v16 = vmov (!%p265_p9), 0   ;;  %v1597_v28 = vld [vmem:[%s2787_s3 + $0x8] sm:$0xff] (!%p265_p9) }
   0xe   : > { %268 = sbr.rel (%p265_p9) target bundleno = 845 (0x34d), region = 52  ;;  %2098 = vmatprep.mubr.msk.f32.mxu1 (!%p265_p9), %vm518_vm0, %v514_v0  ;;  %v1974_v1 = vld [vmem:[%s2786_s2 + $0x40] sm:$0xff] (!%p265_p9)  ;;  %2304 = vset.pattern.permute.xlu0 (!%p265_p9), %v2374_v16  ;;  %v2375_v18 = vmov (!%p265_p9), 683565275   ;;  %v2376_v20 = vmov (!%p265_p9), 2475754826  }
   0xf   : > { %2130 = vmatprep.mubr.msk.f32.mxu0 (!%p265_p9), %vm518_vm0, %v1974_v1  ;;  %v1596_v12 = vld [vmem:[%s2787_s3] sm:$0xff] (!%p265_p9)  ;;  %2305 = vset.pattern.permute.xlu1 (!%p265_p9), %v2374_v16  ;;  %v2377_v22 = vmov (!%p265_p9), 2131351028   ;;  %v2378_v24 = vmov (!%p265_p9), 2102212464   ;;  %v1599_v29 = vld [vmem:[%s2787_s3 + $0x18] sm:$0xff] (!%p265_p9) }
  0x10   : > { %1602 = vperm.xlu0 (!%p265_p9), %2304, %v1596_v12   ;;  %1612 = vperm.xlu1 (!%p265_p9), %2305, %v1598_v13   ;;  %v2379_v26 = vmov (!%p265_p9), 920167782   ;;  %v2380_v35 = vmov (!%p265_p9), 1326507024   ;;  %v1640_v43 = vld [vmem:[%s2789_s5] sm:$0xff] (!%p265_p9)  ;;  %v1641_v44 = vld [vmem:[%s2789_s5 + $0x8] sm:$0xff] (!%p265_p9) }
  0x11   : > { %v1642_v57 = vld [vmem:[%s2789_s5 + $0x10] sm:$0xff] (!%p265_p9)  ;;  %v1643_v58 = vld [vmem:[%s2789_s5 + $0x18] sm:$0xff] (!%p265_p9)  ;;  %v1775_v0 = vld [vmem:[%s2791_s7] sm:$0x3] (!%p265_p9)  ;;  %s294_s26 = sand.u32 (!%p265_p9), 1, %s2364_s28   ;;  %s2030_s12 = sshll.u32 (!%p265_p9), %s2451_s9, 5 }
  0x12   : > { %s1932_s10 = sshll.u32 (!%p265_p9), %s294_s26, 1  ;;  %s1856_s21 = scalar_lea.sflag (!%p265_p9), [#allocation3], %s294_s26 }
  0x13   : > { %s296_s13 = scalar_lea.vmem (!%p265_p9), [#allocation2], %s1932_s10 }
  0x14   : > { %1607 = vperm.xlu0 (!%p265_p9), %2304, %v1597_v28   ;;  %1617 = vperm.xlu1 (!%p265_p9), %2305, %v1599_v29  }
  0x15   : > { %s298_s17 = scalar_select %p297_p10, %s2451_s9, 2 }
  0x16   : > { %s2384_s9 = smov [#allocation2]  }
  0x17   : > { %s1933_s20 = sshll.u32 %s298_s17, 1  ;;  %s1869_s17 = sshll.u32 %s296_s13, 4  ;;  %s2744_s17 = int_to_ptr.vmem [resolvable:$true] %s1869_s17 }
  0x18   : > { %s300_s25 = scalar_lea.vmem %s2784_s0, %s1933_s20  ;;  %1646 = vperm.xlu0 %2304, %v1640_v43   ;;  %1651 = vperm.xlu1 %2305, %v1641_v44   ;;  %s2742_s20 = scalar_lea.hbm %s2792_s8, %s2030_s12 }
  0x19   : > { %v301_v2 = vld [vmem:[%s300_s25] sm:$0x3]  ;;  %s2310_s22 = scalar_lea.vmem %s2744_s17, 32  ;;  %s2314_s23 = sshll.u32 %s2384_s9, 4  ;;  %s2315_s23 = int_to_ptr.vmem [resolvable:$false] %s2314_s23 }
  0x1a   : > { %v2491_v3 = vmul.f32 0.5, %v301_v2  ;;  %p2311_p11 = scmp.ne.s32.totalorder %s2744_s17, %s2310_s22  ;;  %s2316_s24 = scalar_lea.vmem %s2315_s23, 64 }
  0x1b   : > { %p2317_p0 = scmp.lt.s32.totalorder %s2744_s17, %s2315_s23  ;;  %p2318_p1 = scmp.lt.s32.totalorder %s2316_s24, %s2310_s22 }
  0x1c   : > { %v306_v4 = vand.u32 2139095040, %v2491_v3  ;;  %v303_v6 = vand.u32 2147483647, %v2491_v3  ;;  %1656 = vperm.xlu0 %2304, %v1642_v57   ;;  %1661 = vperm.xlu1 %2305, %v1643_v58   ;;  %vm305_vm8 = vcmp.lt.s32.totalorder %v2491_v3, 0  ;;  %v511_v58 = vld [vmem:[%s2785_s1 + $0x8] sm:$0xff]  ;;  %p2312_p12 = pnand %p2311_p11, %p2468_p5 }
  0x1d   : > { %p2319_p2 = por %p2318_p1, %p2317_p0 }
  0x1e   : > { %v307_v5 = vshrl.u32 %v306_v4, 23  ;;  %v310_v9 = vand.u32 8388607, %v303_v6  ;;  %vm304_vm9 = vcmp.le.f32.partialorder %v303_v6, 0.7853982  ;;  %p2313_p13 = pneg %p2312_p12 }
  0x20   : > { %v1934_v7 = vadd.s32 4294967169, %v307_v5  ;;  %v311_v14 = vor.u32 8388608, %v310_v9  ;;  %1778 = vperm.xlu0 %2304, %v1775_v0   ;;  %p2320_p3 = pnand %p2319_p2, %p2313_p13 }
  0x22   : > { %v313_v8 = vadd.s32 1, %v1934_v7  ;;  %v351_v37 = vshll.u32 %v311_v14, 8 }
  0x24   : > { %vm314_vm1 = vcmp.gt.s32.totalorder %v313_v8, 0 }
  0x25   : > { %v315_v10 = vsel %vm314_vm1, %v313_v8, 0  ;;  %vm395_vm1 = vweird.f32 %v2491_v3 }
  0x26   : > { %v317_v11 = vand.u32 31, %v315_v10  ;;  %v316_v15 = vshrl.u32 %v315_v10, 5 }
  0x28   : > { %v318_v17 = vsub.s32 32, %v317_v11  ;;  %v320_v19 = vshll.u32 %v2375_v18, %v317_v11  ;;  %v323_v21 = vshll.u32 %v2376_v20, %v317_v11  ;;  %v326_v23 = vshll.u32 %v2377_v22, %v317_v11 }
  0x29   : > { %v329_v25 = vshll.u32 %v2378_v24, %v317_v11  ;;  %v332_v27 = vshll.u32 %v2379_v26, %v317_v11  ;;  %vm335_vm2 = vcmp.lt.s32.totalorder %v316_v15, 1  ;;  %vm338_vm3 = vcmp.lt.s32.totalorder %v316_v15, 4 }
  0x2a   : > { %v319_v30 = vshrl.u32 %v2375_v18, %v318_v17  ;;  %v321_v31 = vshrl.u32 %v2376_v20, %v318_v17  ;;  %v324_v32 = vshrl.u32 %v2377_v22, %v318_v17  ;;  %v327_v33 = vshrl.u32 %v2378_v24, %v318_v17 }
  0x2b   : > { %v330_v34 = vshrl.u32 %v2379_v26, %v318_v17  ;;  %v333_v36 = vshrl.u32 %v2380_v35, %v318_v17  ;;  %vm336_vm4 = vcmp.lt.s32.totalorder %v316_v15, 2  ;;  %vm337_vm5 = vcmp.lt.s32.totalorder %v316_v15, 3 }
  0x2c   : > { %v322_v38 = vor.u32 %v321_v31, %v320_v19  ;;  %v325_v39 = vor.u32 %v324_v32, %v323_v21  ;;  %v328_v40 = vor.u32 %v327_v33, %v326_v23 }
  0x2d   : > { %v331_v41 = vor.u32 %v330_v34, %v329_v25  ;;  %v334_v42 = vor.u32 %v333_v36, %v332_v27 }
  0x2e   : > { %v339_v45 = vsel %vm335_vm2, %v319_v30, %v322_v38  ;;  %v340_v46 = vsel %vm338_vm3, %v328_v40, 2102212464  ;;  %v343_v47 = vsel %vm335_vm2, %v322_v38, %v325_v39  ;;  %v347_v48 = vsel %vm335_vm2, %v325_v39, %v328_v40 }
  0x2f   : > { %v341_v49 = vsel %vm337_vm5, %v325_v39, %v340_v46  ;;  %v344_v50 = vsel %vm338_vm3, %v331_v41, 920167782  ;;  %v348_v51 = vsel %vm338_vm3, %v334_v42, 1326507024  ;;  %vm531_vm2 = vcmask 1041408   ;;  %v515_v46 = vld [vmem:[%s2786_s2 + $0x8] sm:$0xff] }
  0x30   : > { %v345_v52 = vsel %vm337_vm5, %v328_v40, %v344_v50  ;;  %v349_v53 = vsel %vm337_vm5, %v331_v41, %v348_v51  ;;  %v342_v54 = vsel %vm336_vm4, %v339_v45, %v341_v49  ;;  %vm1664_vm3 = vcmask 261120  }
  0x31   : > { %v346_v55 = vsel %vm336_vm4, %v343_v47, %v345_v52  ;;  %v350_v56 = vsel %vm336_vm4, %v347_v48, %v349_v53  ;;  %v358_v63 = vmul.u32 %v351_v37, %v342_v54  ;;  %v516_v48 = vld [vmem:[%s2786_s2 + $0x10] sm:$0xff]  ;;  %v517_v52 = vld [vmem:[%s2786_s2 + $0x18] sm:$0xff]  ;;  %v510_v54 = vld [vmem:[%s2785_s1] sm:$0xff] }
  0x32   : > { %v2527_v59 = vmul.u32.u64.low %v351_v37, %v350_v56  ;;  %v2528_v60 = vmul.u32.u64.high %v351_v37, %v350_v56, %v2527_v59  ;;  %v2530_v61 = vmul.u32.u64.low %v351_v37, %v346_v55  ;;  %v2531_v62 = vmul.u32.u64.high %v351_v37, %v346_v55, %v2530_v61 }
  0x34   : > { %vm360_vm6 = vc.u32 %v2528_v60, %v2530_v61  ;;  %v361_v1 = vadd.s32 1, %v2531_v62  ;;  %v359_v14 = vadd.s32 %v2530_v61, %v2528_v60  ;;  %v512_v61 = vld [vmem:[%s2785_s1 + $0x10] sm:$0xff] }
  0x36   : > { %v362_v2 = vsel %vm360_vm6, %v361_v1, %v2531_v62  ;;  %v1975_v62 = vld [vmem:[%s2786_s2 + $0x48] sm:$0xff]  ;;  %v513_v1 = vld [vmem:[%s2785_s1 + $0x18] sm:$0xff] }
  0x37   : > { %v363_v4 = vadd.s32 %v362_v2, %v358_v63  ;;  %v1976_v63 = vld [vmem:[%s2786_s2 + $0x50] sm:$0xff]  ;;  %v1956_v2 = vld [vmem:[%s2786_s2 + $0x20] sm:$0xff] }
  0x39   : > { %v364_v5 = vadd.s32 536870912, %v363_v4 }
  0x3b   : > { %v365_v7 = vshrl.u32 %v364_v5, 30 }
  0x3d   : > { %v366_v8 = vshll.u32 %v365_v7, 30  ;;  %v389_v26 = vsub.s32 4, %v365_v7 }
  0x3f   : > { %v367_v9 = vsub.s32 %v363_v4, %v366_v8  ;;  %v390_v29 = vsel %vm305_vm8, %v389_v26, %v365_v7  ;;  %v1977_v7 = vld [vmem:[%s2786_s2 + $0x58] sm:$0xff]  ;;  %v1970_v8 = vld [vmem:[%s2785_s1 + $0x40] sm:$0xff] }
  0x40   : > { %v392_v32 = vsel %vm304_vm9, 0, %v390_v29  ;;  %v1955_v26 = vld [vmem:[%s2785_s1 + $0x38] sm:$0xff] }
  0x41   : > { %v369_v10 = vsub.s32 0, %v367_v9  ;;  %v396_v33 = vadd.s32 3, %v392_v32  ;;  %v500_v34 = vand.u32 3, %v392_v32 }
  0x43   : > { %v1935_v11 = vmin.u32 %v369_v10, %v367_v9  ;;  %v397_v35 = vand.u32 3, %v396_v33  ;;  %vm505_vm10 = vcmp.eq.s32.totalorder %v500_v34, 2  ;;  %vm502_vm12 = vcmp.eq.s32.totalorder %v500_v34, 0  ;;  %v1957_v10 = vld [vmem:[%s2786_s2 + $0x28] sm:$0xff]  ;;  %v1991_v33 = vld [vmem:[%s2785_s1 + $0x78] sm:$0xff] }
  0x44   : > { %vm501_vm14 = vcmp.lt.s32.totalorder %v500_v34, 2  ;;  %v2010_v34 = vld [vmem:[%s2786_s2 + $0x80] sm:$0xff] }
  0x45   : > { %v371_v12 = vclz %v1935_v11  ;;  %vm402_vm11 = vcmp.eq.s32.totalorder %v397_v35, 2  ;;  %vm399_vm13 = vcmp.eq.s32.totalorder %v397_v35, 0  ;;  %vm398_vm15 = vcmp.lt.s32.totalorder %v397_v35, 2  ;;  %v1958_v11 = vld [vmem:[%s2786_s2 + $0x30] sm:$0xff]  ;;  %v2011_v35 = vld [vmem:[%s2786_s2 + $0x88] sm:$0xff] }
  0x47   : > { %v1936_v13 = vadd.s32 4294967294, %v371_v12 }
  0x49   : > { %vm1937_vm7 = vcmp.lt.s32.totalorder %v1936_v13, 0 }
  0x4a   : > { %v374_v15 = vsel %vm1937_vm7, 0, %v1936_v13  ;;  %v1971_v13 = vld [vmem:[%s2785_s1 + $0x48] sm:$0xff]  ;;  %vm2382_vm7 = vmmov 0  }
  0x4b   : > { %v375_v16 = vsub.s32 32, %v374_v15  ;;  %v376_v17 = vshll.u32 %v367_v9, %v374_v15  ;;  %v379_v18 = vsub.s32 4294967266, %v374_v15 }
  0x4d   : > { %v377_v19 = vshrl.u32 %v359_v14, %v375_v16  ;;  %v380_v20 = vadd.s32 127, %v379_v18  ;;  %v1972_v14 = vld [vmem:[%s2785_s1 + $0x50] sm:$0xff]  ;;  %v1959_v16 = vld [vmem:[%s2786_s2 + $0x38] sm:$0xff] }
  0x4e   : > { %v1973_v18 = vld [vmem:[%s2785_s1 + $0x58] sm:$0xff] }
  0x4f   : > { %v378_v21 = vor.u32 %v377_v19, %v376_v17  ;;  %v381_v22 = vshll.u32 %v380_v20, 23  ;;  %v1952_v17 = vld [vmem:[%s2785_s1 + $0x20] sm:$0xff] }
  0x50   : > { %v1992_v19 = vld [vmem:[%s2786_s2 + $0x60] sm:$0xff] }
  0x51   : > { %v382_v23 = vor.u32 4788187, %v381_v22  ;;  %v385_v24 = vcvt.s32.f32 %v378_v21  ;;  %v1953_v21 = vld [vmem:[%s2785_s1 + $0x28] sm:$0xff]  ;;  %v1954_v22 = vld [vmem:[%s2785_s1 + $0x30] sm:$0xff] }
  0x53   : > { %v383_v25 = vand.u32 2147483647, %v382_v23  ;;  %v1993_v23 = vld [vmem:[%s2786_s2 + $0x68] sm:$0xff] }
  0x55   : > { %v386_v27 = vmul.f32 %v385_v24, %v383_v25  ;;  %v1994_v24 = vld [vmem:[%s2786_s2 + $0x70] sm:$0xff] }
  0x57   : > { %v387_v28 = vxor.u32 2147483648, %v386_v27 }
  0x59   : > { %v388_v30 = vsel %vm305_vm8, %v387_v28, %v386_v27  ;;  %v1995_v27 = vld [vmem:[%s2786_s2 + $0x78] sm:$0xff]  ;;  %v1988_v28 = vld [vmem:[%s2785_s1 + $0x60] sm:$0xff] }
  0x5a   : > { %v391_v31 = vsel %vm304_vm9, %v2491_v3, %v388_v30  ;;  %v1989_v30 = vld [vmem:[%s2785_s1 + $0x68] sm:$0xff] }
  0x5b   : > { %2306 = vcosq.f32 %v391_v31 }
  0x5c   : > { %2308 = vsinq.f32 %v391_v31  ;;  %v1990_v31 = vld [vmem:[%s2785_s1 + $0x70] sm:$0xff] }
  0x65   : > { %v2307_v36 = vpop.eup %2306 }
  0x66   : > { %v2309_v37 = vpop.eup %2308  ;;  %v403_v38 = vxor.u32 2147483648, %v2307_v36 }
  0x67   : > { %v400_v39 = vxor.u32 2147483648, %v2309_v37 }
  0x68   : > { %v507_v6 = vsel %vm505_vm10, %v403_v38, %v2309_v37  ;;  %v404_v40 = vsel %vm402_vm11, %v403_v38, %v2309_v37  ;;  %v2013_v37 = vld [vmem:[%s2786_s2 + $0x98] sm:$0xff]  ;;  %v2006_v38 = vld [vmem:[%s2785_s1 + $0x80] sm:$0xff] }
  0x69   : > { %v504_v41 = vsel %vm502_vm12, %v2307_v36, %v400_v39  ;;  %v401_v42 = vsel %vm399_vm13, %v2307_v36, %v400_v39  ;;  %v2012_v36 = vld [vmem:[%s2786_s2 + $0x90] sm:$0xff]  ;;  %v2007_v39 = vld [vmem:[%s2785_s1 + $0x88] sm:$0xff] }
  0x6a   : > { %v508_v43 = vsel %vm501_vm14, %v504_v41, %v507_v6  ;;  %v405_v44 = vsel %vm398_vm15, %v401_v42, %v404_v40  ;;  %v2008_v6 = vld [vmem:[%s2785_s1 + $0x90] sm:$0xff]  ;;  %v2009_v40 = vld [vmem:[%s2785_s1 + $0x98] sm:$0xff]  ;;  %v1636_v41 = vld [vmem:[%s2788_s4] sm:$0xff] }
  0x6b   : > { %v509_v45 = vsel %vm395_vm1, nan, %v508_v43  ;;  %v406_v47 = vsel %vm395_vm1, nan, %v405_v44 }
  0x6c   : > { %2096 = vmatprep.subr.msk.mxu1 %vm531_vm2, %v509_v45  ;;  %v720_v3 = vmul.f32 %v509_v45, %v406_v47  ;;  %v722_v49 = vmul.f32 %v406_v47, %v406_v47 }
  0x6d   : > { %2097 = vmatpush3.msk.msra.mxu1 %vm531_vm2, %v509_v45 }
  0x6e   : > { %2099 = vmatmul.mubr.msk.f32.vlgmr.msra.gmra.mrb[0].mxu1 %vm518_vm0, %v515_v46  ;;  %2104 = vmatprep.subr.msk.mxu1 %vm531_vm2, %v406_v47  ;;  %v721_v50 = vmul.f32 2.0, %v720_v3  ;;  %v723_v51 = vmul.f32 2.0, %v722_v49 }
  0x6f   : > { %2101 = vmatprep.mubr.msk.f32.mxu1 %vm518_vm0, %v516_v48  ;;  %2105 = vmatpush3.msk.msra.mxu1 %vm531_vm2, %v406_v47 }
  0x70   : > { %v724_v53 = vsub.f32 1.0, %v723_v51  ;;  %v941_v55 = vmul.f32 %v721_v50, %v721_v50 }
  0x72   : > { %2102 = vmatmul.mubr.msk.f32.gmra.mrb[2].mxu1 %vm518_vm0, %v517_v52  ;;  %v942_v56 = vmul.f32 2.0, %v941_v55  ;;  %v939_v57 = vmul.f32 %v724_v53, %v721_v50  ;;  %2112 = vmatprep.subr.msk.mxu1 %vm531_vm2, %v724_v53 }
  0x73   : > { %2106 = vmatprep.mubr.msk.f32.mxu1 %vm518_vm0, %v510_v54 }
  0x74   : > { %v943_v59 = vsub.f32 1.0, %v942_v56  ;;  %v940_v60 = vmul.f32 2.0, %v939_v57 }
  0x76   : > { %2128 = vmatprep.subr.msk.mxu0 %vm531_vm2, %v943_v59  ;;  %2107 = vmatmul.mubr.msk.f32.vlgmr.msra.gmra.mrb[0].mxu1 %vm518_vm0, %v511_v58  ;;  %v1160_v0 = vmul.f32 %v940_v60, %v940_v60  ;;  %v1158_v5 = vmul.f32 %v943_v59, %v940_v60 }
  0x77   : > { %2129 = vmatpush3.msk.msra.mxu0 %vm531_vm2, %v943_v59  ;;  %2109 = vmatprep.mubr.msk.f32.mxu1 %vm518_vm0, %v512_v61 }
  0x78   : > { %2131 = vmatmul.mubr.msk.f32.vlgmr.msra.gmra.mrb[0].mxu0 %vm518_vm0, %v1975_v62  ;;  %2136 = vmatprep.subr.msk.mxu0 %vm531_vm2, %v940_v60  ;;  %v1161_v4 = vmul.f32 2.0, %v1160_v0  ;;  %v1159_v12 = vmul.f32 2.0, %v1158_v5 }
  0x79   : > { %2137 = vmatpush3.msk.msra.mxu0 %vm531_vm2, %v940_v60  ;;  %2133 = vmatprep.mubr.msk.f32.mxu0 %vm518_vm0, %v1976_v63 }
  0x7a   : > { %2110 = vmatmul.mubr.msk.f32.gmra.mrb[2].mxu1 %vm518_vm0, %v513_v1  ;;  %v1162_v9 = vsub.f32 1.0, %v1161_v4  ;;  %v1379_v15 = vmul.f32 %v1159_v12, %v1159_v12 }
  0x7b   : > { %2113 = vmatpush3.msk.msra.mxu1 %vm531_vm2, %v724_v53  ;;  %2114 = vmatprep.mubr.msk.f32.mxu1 %vm518_vm0, %v1956_v2 }
  0x7c   : > { %2134 = vmatmul.mubr.msk.f32.gmra.mrb[2].mxu0 %vm518_vm0, %v1977_v7  ;;  %2144 = vmatprep.subr.msk.mxu0 %vm531_vm2, %v1162_v9  ;;  %v1380_v20 = vmul.f32 2.0, %v1379_v15  ;;  %v1377_v29 = vmul.f32 %v1162_v9, %v1159_v12 }
  0x7d   : > { %2138 = vmatprep.mubr.msk.f32.mxu0 %vm518_vm0, %v1970_v8  ;;  %2120 = vmatprep.subr.msk.mxu1 %vm531_vm2, %v721_v50 }
  0x7e   : > { %2115 = vmatmul.mubr.msk.f32.vlgmr.msra.gmra.mrb[0].mxu1 %vm518_vm0, %v1957_v10  ;;  %v1381_v25 = vsub.f32 1.0, %v1380_v20  ;;  %v1378_v32 = vmul.f32 2.0, %v1377_v29  ;;  %v1638_v10 = vld [vmem:[%s2788_s4 + $0x10] sm:$0xff] }
  0x7f   : > { %2117 = vmatprep.mubr.msk.f32.mxu1 %vm518_vm0, %v1958_v11  ;;  %2121 = vmatpush3.msk.msra.mxu1 %vm531_vm2, %v721_v50  ;;  %v1639_v11 = vld [vmem:[%s2788_s4 + $0x18] sm:$0xff] }
  0x80   : > { %2139 = vmatmul.mubr.msk.f32.vlgmr.msra.gmra.mrb[0].mxu0 %vm518_vm0, %v1971_v13  ;;  %v2383_v13 = vmov 0.0  }
  0x81   : > { %2145 = vmatpush3.msk.msra.mxu0 %vm531_vm2, %v1162_v9  ;;  %2141 = vmatprep.mubr.msk.f32.mxu0 %vm518_vm0, %v1972_v14  ;;  %v1637_v9 = vld [vmem:[%s2788_s4 + $0x8] sm:$0xff] }
  0x82   : > { %2118 = vmatmul.mubr.msk.f32.gmra.mrb[2].mxu1 %vm518_vm0, %v1959_v16  ;;  %2152 = vmatprep.subr.msk.mxu0 %vm531_vm2, %v1159_v12 }
  0x83   : > { %2122 = vmatprep.mubr.msk.f32.mxu1 %vm518_vm0, %v1952_v17 }
  0x84   : > { %2142 = vmatmul.mubr.msk.f32.gmra.mrb[2].mxu0 %vm518_vm0, %v1973_v18 }
  0x85   : > { %2146 = vmatprep.mubr.msk.f32.mxu0 %vm518_vm0, %v1992_v19 }
  0x86   : > { %2123 = vmatmul.mubr.msk.f32.vlgmr.msra.gmra.mrb[0].mxu1 %vm518_vm0, %v1953_v21 }
  0x87   : > { %2125 = vmatprep.mubr.msk.f32.mxu1 %vm518_vm0, %v1954_v22 }
  0x88   : > { %2147 = vmatmul.mubr.msk.f32.vlgmr.msra.gmra.mrb[0].mxu0 %vm518_vm0, %v1993_v23 }
  0x89   : > { %2153 = vmatpush3.msk.msra.mxu0 %vm531_vm2, %v1159_v12  ;;  %2149 = vmatprep.mubr.msk.f32.mxu0 %vm518_vm0, %v1994_v24  ;;  %v2381_v12 = vmov 0.0|0.0  }
  0x8a   : > { %2126 = vmatmul.mubr.msk.f32.gmra.mrb[2].mxu1 %vm518_vm0, %v1955_v26  ;;  %2160 = vmatprep.subr.msk.mxu0 %vm531_vm2, %v1381_v25 }
  0x8b   : > { %2184 = vmatprep.mubr.msk.f32.mxu1 %vm1664_vm3, %v1636_v41 }
  0x8c   : > { %2150 = vmatmul.mubr.msk.f32.gmra.mrb[2].mxu0 %vm518_vm0, %v1995_v27 }
  0x8d   : > { %2154 = vmatprep.mubr.msk.f32.mxu0 %vm518_vm0, %v1988_v28 }
  0x8f   : > { %v1603_v46 = vpop.permute.xlu0 %1602  ;;  %v1613_v47 = vpop.permute.xlu1 %1612 }
  0x90   : > { %2155 = vmatmul.mubr.msk.f32.vlgmr.msra.gmra.mrb[0].mxu0 %vm518_vm0, %v1989_v30 }
  0x91   : > { %2161 = vmatpush3.msk.msra.mxu0 %vm531_vm2, %v1381_v25  ;;  %2157 = vmatprep.mubr.msk.f32.mxu0 %vm518_vm0, %v1990_v31 }
  0x92   : > { %2168 = vmatprep.subr.msk.mxu0 %vm531_vm2, %v1378_v32 }
  0x93   : > { %v1608_v50 = vpop.permute.xlu0 %1607  ;;  %v1618_v58 = vpop.permute.xlu1 %1617 }
  0x94   : > { %2158 = vmatmul.mubr.msk.f32.gmra.mrb[2].mxu0 %vm518_vm0, %v1991_v33 }
  0x95   : > { %2162 = vmatprep.mubr.msk.f32.mxu0 %vm518_vm0, %v2010_v34 }
  0x97   : > { %v1652_v14 = vpop.permute.xlu1 %1651  ;;  %v1647_v15 = vpop.permute.xlu0 %1646 }
  0x98   : > { %2163 = vmatmul.mubr.msk.f32.vlgmr.msra.gmra.mrb[0].mxu0 %vm518_vm0, %v2011_v35 }
  0x99   : > { %2169 = vmatpush3.msk.msra.mxu0 %vm531_vm2, %v1378_v32  ;;  %2165 = vmatprep.mubr.msk.f32.mxu0 %vm518_vm0, %v2012_v36  ;;  %v1774_v36 = vld [vmem:[%s2790_s6] sm:$0x3] }
  0x9b   : > { %v1662_v21 = vpop.permute.xlu1 %1661  ;;  %v1657_v24 = vpop.permute.xlu0 %1656 }
  0x9c   : > { %2166 = vmatmul.mubr.msk.f32.gmra.mrb[2].mxu0 %vm518_vm0, %v2013_v37 }
  0x9d   : > { %2170 = vmatprep.mubr.msk.f32.mxu0 %vm518_vm0, %v2006_v38 }
  0x9f   : > { %v1779_v37 = vpop.permute.xlu0 %1778 }
  0xa0   : > { %2171 = vmatmul.mubr.msk.f32.vlgmr.msra.gmra.mrb[0].mxu0 %vm518_vm0, %v2007_v39 }
  0xa1   : > { %2173 = vmatprep.mubr.msk.f32.mxu0 %vm518_vm0, %v2008_v6 }
  0xa4   : > { %2174 = vmatmul.mubr.msk.f32.gmra.mrb[2].mxu0 %vm518_vm0, %v2009_v40 }
 0x159   : > { %v2124_v42 = vpop.f32.mrb[0].mxu1 }
 0x15a   : > { %v916_v43 = vpop.f32.mrb[1].mxu1 }
 0x15d   : > { %v2127_v44 = vpop.f32.mrb[2].mxu1 }
 0x15e   : > { %v926_v45 = vpop.f32.mrb[3].mxu1 }
 0x173   : > { %v2172_v48 = vpop.f32.mrb[0].mxu0 }
 0x174   : > { %v2215_v3 = vadd.f32 %v2172_v48, %v2124_v42  ;;  %v1573_v49 = vpop.f32.mrb[1].mxu0 }
 0x175   : > { %v2216_v51 = vadd.f32 %v1573_v49, %v916_v43 }
 0x176   : > { %v1621_v52 = vadd.f32 %v2215_v3, %v1608_v50 }
 0x177   : > { %v1620_v53 = vadd.f32 %v2216_v51, %v1603_v46  ;;  %v2175_v54 = vpop.f32.mrb[2].mxu0 }
 0x178   : > { %vm1625_vm0 = vcmp.ge.f32.partialorder %v1621_v52, 0.0  ;;  %v1629_v55 = vmul.f32 0.2, %v1621_v52  ;;  %v2217_v56 = vadd.f32 %v2175_v54, %v2127_v44  ;;  %v1583_v57 = vpop.f32.mrb[3].mxu0 }
 0x179   : > { %vm1624_vm4 = vcmp.ge.f32.partialorder %v1620_v53, 0.0  ;;  %v1628_v59 = vmul.f32 0.2, %v1620_v53  ;;  %v2218_v60 = vadd.f32 %v1583_v57, %v926_v45 }
 0x17a   : > { %v1623_v61 = vadd.f32 %v2217_v56, %v1618_v58  ;;  %v1633_v62 = vsel %vm1625_vm0, %v1621_v52, %v1629_v55 }
 0x17b   : > { %v1622_v63 = vadd.f32 %v2218_v60, %v1613_v47  ;;  %v1632_v0 = vsel %vm1624_vm4, %v1620_v53, %v1628_v59 }
 0x17c   : > { %vm1627_vm5 = vcmp.ge.f32.partialorder %v1623_v61, 0.0  ;;  %v1631_v1 = vmul.f32 0.2, %v1623_v61  ;;  %v2201_v2 = vpack.c.bf16 %v1633_v62, %v1632_v0 }
 0x17d   : > { %vm1626_vm6 = vcmp.ge.f32.partialorder %v1622_v63, 0.0  ;;  %v1630_v4 = vmul.f32 0.2, %v1622_v63 }
 0x17e   : > { %2202 = vmatprep.subr.bf16.mxu1 %v2201_v2  ;;  %v1635_v5 = vsel %vm1627_vm5, %v1623_v61, %v1631_v1 }
 0x17f   : > { %2204 = vmatpush3.bf16.msra.mxu1 %v2201_v2  ;;  %v1634_v7 = vsel %vm1626_vm6, %v1622_v63, %v1630_v4 }
 0x180   : > { %v2205_v8 = vpack.c.bf16 %v1635_v5, %v1634_v7 }
 0x182   : > { %2206 = vmatprep.subr.bf16.mxu1 %v2205_v8 }
 0x183   : > { %2208 = vmatpush3.bf16.msra.mxu1 %v2205_v8 }
 0x184   : > { %2209 = vmatprep.subr.bf16.mxu1 %v2381_v12 }
 0x186   : > { %2185 = vmatmul.mubr.msk.f32.vlgmr.msra.gmra.mrb[4].mxu1 %vm1664_vm3, %v1637_v9 }
 0x187   : > { %2187 = vmatprep.mubr.msk.f32.mxu1 %vm1664_vm3, %v1638_v10 }
 0x18a   : > { %2188 = vmatmul.mubr.msk.f32.gmra.mrb[6].mxu1 %vm1664_vm3, %v1639_v11 }
 0x18b   : > { %2198 = vmatprep.mubr.msk.f32.mxu1 %vm2382_vm7, %v2383_v13 }
 0x259   : > { %v2186_v16 = vpop.f32.mrb[4].mxu1 }
 0x25a   : > { %v1749_v17 = vadd.f32 %v2186_v16, %v1652_v14  ;;  %v1743_v18 = vpop.f32.mrb[5].mxu1 }
 0x25b   : > { %v1744_v19 = vadd.f32 %v1743_v18, %v1647_v15 }
 0x25c   : > { %vm1763_vm8 = vcmp.ge.f32.partialorder %v1749_v17, 0.0  ;;  %v1767_v20 = vmul.f32 0.2, %v1749_v17 }
 0x25d   : > { %vm1762_vm9 = vcmp.ge.f32.partialorder %v1744_v19, 0.0  ;;  %v1766_v22 = vmul.f32 0.2, %v1744_v19  ;;  %v2189_v23 = vpop.f32.mrb[6].mxu1 }
 0x25e   : > { %v1771_v25 = vsel %vm1763_vm8, %v1749_v17, %v1767_v20  ;;  %v1759_v26 = vadd.f32 %v2189_v23, %v1662_v21  ;;  %v1753_v27 = vpop.f32.mrb[7].mxu1 }
 0x25f   : > { %v1770_v28 = vsel %vm1762_vm9, %v1744_v19, %v1766_v22  ;;  %v1754_v29 = vadd.f32 %v1753_v27, %v1657_v24 }
 0x260   : > { %v2210_v30 = vpack.c.bf16 %v1771_v25, %v1770_v28  ;;  %vm1765_vm10 = vcmp.ge.f32.partialorder %v1759_v26, 0.0  ;;  %v1769_v31 = vmul.f32 0.2, %v1759_v26 }
 0x261   : > { %vm1764_vm11 = vcmp.ge.f32.partialorder %v1754_v29, 0.0  ;;  %v1768_v32 = vmul.f32 0.2, %v1754_v29 }
 0x262   : > { %v1773_v33 = vsel %vm1765_vm10, %v1759_v26, %v1769_v31  ;;  %2211 = vmatpush3.bf16.msra.mxu1 %v2210_v30 }
 0x263   : > { %v1772_v34 = vsel %vm1764_vm11, %v1754_v29, %v1768_v32  ;;  %2212 = vmatprep.subr.bf16.mxu1 %v2381_v12 }
 0x264   : > { %v2213_v35 = vpack.c.bf16 %v1773_v33, %v1772_v34 }
 0x266   : > { %2214 = vmatpush3.bf16.msra.mxu1 %v2213_v35 }
 0x269   : > { %2199 = vmatmul.mubr.msk.f32.vlgmr.msra.gmra.mrb[8].mxu1 %vm1664_vm3, %v1774_v36 }
 0x33c   : > { %v1850_v38 = vpop.f32.mrb[8].mxu1 }
 0x33d   : > { %v1851_v39 = vadd.f32 %v1850_v38, %v1779_v37  ;;  %v2200_v6 = vpop.f32.mrb[9].mxu1 }
 0x33f   : > { %1854 = vst [vmem:[%s296_s13] sm:$0x3] %v1851_v39 }
 0x340   : > { %2323 = shalt.err (!%p2320_p3)
}
 0x341   : > { %s2324_s25 = scalar_lea.hbm %s2742_s20, 32  ;;  %s2328_s12 = scalar_lea.hbm %s2792_s8, 96 }
 0x342   : > { %p2325_p4 = scmp.ne.s32.totalorder %s2742_s20, %s2324_s25  ;;  %p2329_p9 = scmp.lt.u32.totalorder %s2742_s20, %s2792_s8 }
 0x343   : > { %p2330_p10 = scmp.lt.u32.totalorder %s2328_s12, %s2324_s25  ;;  %p2332_p12 = scmp.lt.u32.totalorder %s2324_s25, %s2742_s20 }
 0x344   : > { %p2326_p7 = pnand %p2325_p4, %p2468_p5 }
 0x345   : > { %p2331_p11 = por %p2330_p10, %p2329_p9 }
 0x346   : > { %p2327_p8 = pneg %p2326_p7 }
 0x347   : > { %p2333_p13 = por %p2332_p12, %p2331_p11 }
 0x349   : > { %p2334_p0 = pnand %p2333_p13, %p2327_p8 }
 0x34b   : > { %2337 = shalt.err (!%p2334_p0)
}
 0x34c   : > { %2255 = dma.vmem_to_hbm [thread:$0]  (%p2468_p5), %s2744_s17, 32, %s2742_s20, %s1856_s21  }
 0x34d PF: > { %p2261_p1 = scmp.ge.s32.totalorder %s2372_s30, 2  ;;  %s1881_s19 = sand.u32 1, %s2360_s27  }
 0x34e   : > { %s1882_s22 = scalar_lea.sflag [#allocation3], %s1881_s19 }
 0x34f   : > { %p2258_p2 = pnand %p2261_p1, %p2472_p6 }
 0x351   : > { %2355 = dma.done.wait (!%p2258_p2), %s1882_s22, 32  }
 0x352   : > { %2357 = vsyncadd (!%p2258_p2), %s1882_s22, 4294967264  ;;  %p18_p3 = scmp.ge.s32.totalorder %s2455_s11, 5   ;;  %s2795_s27 = smov %s2364_s28 }
 0x353   : > { %s2796_s28 = smov %s2368_s29  ;;  %s2797_s29 = smov %s2466_s14 }
 0x354   : > { %s2798_s30 = smov %s2455_s11  ;;  %20 = sbr.rel (!%p18_p3) target bundleno = 3 (0x3), region = 95 }
 0x35b   :  { %1887 = vsyncpa [#allocation3], 1 }
 0x35c   :  { %1889 = vsyncpa [#allocation3 + $0x1], 1 }

</bundles_post_ra>
